<compile_context>
chip_gen: v7x
topology: tpu7x:2x2x1
jax: 0.10.0
libtpu: 0.0.40
codegen_flags: <defaults>
</compile_context>

<pallas_src>
import functools

import jax
import jax.numpy as jnp
from jax.experimental import pallas as pl
from jax.experimental.pallas import tpu as pltpu


# ----------------------------- Pallas kernel ------------------------------ #
def _embed_ln_kernel(ids_ref, w_hbm, p_ref, g_ref, b_ref, o_ref,
                     rows, sem, *, h_true, vocab):
    """One grid step = one (seq_tile, H) chunk of one batch row.

    ids_ref : SMEM (B, S) int32 token ids (scalar-prefetched)
    w_hbm   : HBM  (V, H_pad) word-embedding table (raw ref, manual DMA gather)
    p_ref   : VMEM (seq_tile, H_pad) position-embedding rows for this tile
    g_ref   : VMEM (1, H_pad) LayerNorm gamma
    b_ref   : VMEM (1, H_pad) LayerNorm beta
    o_ref   : VMEM (seq_tile, H_pad) output tile
    rows    : VMEM scratch (seq_tile, H_pad) gathered word rows
    sem     : DMA semaphores (seq_tile,)
    """
    batch = pl.program_id(0)
    j = pl.program_id(1)
    seq_tile = rows.shape[0]
    s0 = j * seq_tile

    # Data-dependent row gather: one small DMA per token, all in flight at once.
    copies = []
    for t in range(seq_tile):
        tok = ids_ref[batch, s0 + t]
        tok = jnp.clip(tok, 0, vocab - 1)          # guard OOB ids (DMA is bounds-checked)
        cp = pltpu.make_async_copy(w_hbm.at[pl.ds(tok, 1), :],
                                   rows.at[pl.ds(t, 1), :],
                                   sem.at[t])
        cp.start()
        copies.append(cp)
    for cp in copies:
        cp.wait()

    # word_emb[id] + pos_emb[pos]   (positions are implied by the grid index)
    x = rows[...].astype(jnp.float32) + p_ref[...].astype(jnp.float32)

    # LayerNorm(eps=1e-12) over the true hidden axis, f32 throughout.
    h_pad = x.shape[-1]
    if h_pad == h_true:
        mean = jnp.mean(x, axis=-1, keepdims=True)
        c = x - mean
        var = jnp.mean(c * c, axis=-1, keepdims=True)
    else:
        # Padded lanes hold zeros (tables are zero-padded); mask them out of LN.
        lane = jax.lax.broadcasted_iota(jnp.int32, x.shape, 1)
        valid = (lane < h_true).astype(jnp.float32)
        x = x * valid
        inv_h = 1.0 / float(h_true)
        mean = jnp.sum(x, axis=-1, keepdims=True) * inv_h
        c = (x - mean) * valid
        var = jnp.sum(c * c, axis=-1, keepdims=True) * inv_h

    y = c * jax.lax.rsqrt(var + 1e-12) * g_ref[...] + b_ref[...]
    o_ref[...] = y.astype(o_ref.dtype)


# ------------------------------- wrapper ----------------------------------- #
def bert_embeddings_for_roc(input_ids, word_emb, pos_emb, ln_gamma, ln_beta,
                            seq_tile=None):
    """Forward pass of BertEmbeddingsForRoc.

    Returns (embedding_output[B,S,H] f32, extended_attention_mask[B,1,1,S] f32).
    """
    B, S = input_ids.shape
    V, H = word_emb.shape
    P = pos_emb.shape[0]
    assert S <= P, "sequence length exceeds max_position_embeddings"

    # Pad hidden dim up to a multiple of 128 so every store is a full
    # unmasked 128-lane vst (wrapper slices the result back).
    H_pad = max(128, ((H + 127) // 128) * 128)

    if seq_tile is None:
        seq_tile = next((t for t in (512, 256, 128, 64, 32, 16, 8) if S % t == 0), S)
    assert S % seq_tile == 0
    # TODO(synk): if S is not a multiple of 8 and S != P, the pos-table
    # BlockSpec below needs a padded P; not exercised for typical BERT shapes.

    def pad_h(a):
        if a.shape[-1] == H_pad:
            return a
        return jnp.pad(a, [(0, 0)] * (a.ndim - 1) + [(0, H_pad - a.shape[-1])])

    w = pad_h(word_emb)                                      # stays in HBM, native dtype
    p = pad_h(pos_emb)
    g = pad_h(ln_gamma.astype(jnp.float32).reshape(1, H))
    beta = pad_h(ln_beta.astype(jnp.float32).reshape(1, H))
    ids = input_ids.astype(jnp.int32)

    grid = (B, S // seq_tile)
    kernel = functools.partial(_embed_ln_kernel, h_true=H, vocab=V)

    n_tok = B * S
    cost = pl.CostEstimate(
        flops=8 * n_tok * H_pad,
        transcendentals=n_tok,
        bytes_accessed=int(
            n_tok * H_pad * (word_emb.dtype.itemsize + pos_emb.dtype.itemsize)
            + n_tok * H_pad * 4            # output writes
            + n_tok * 4))                  # token ids

    out = pl.pallas_call(
        kernel,
        out_shape=jax.ShapeDtypeStruct((B, S, H_pad), jnp.float32),
        grid_spec=pltpu.PrefetchScalarGridSpec(
            num_scalar_prefetch=1,                             # ids -> SMEM
            grid=grid,
            in_specs=[
                pl.BlockSpec(memory_space=pl.ANY),                          # word table (HBM)
                pl.BlockSpec((seq_tile, H_pad), lambda b, j, ids: (j, 0)),  # pos rows
                pl.BlockSpec((1, H_pad), lambda b, j, ids: (0, 0)),         # LN gamma
                pl.BlockSpec((1, H_pad), lambda b, j, ids: (0, 0)),         # LN beta
            ],
            out_specs=pl.BlockSpec((None, seq_tile, H_pad),
                                   lambda b, j, ids: (b, j, 0)),
            scratch_shapes=[
                pltpu.VMEM((seq_tile, H_pad), word_emb.dtype),  # gathered rows
                pltpu.SemaphoreType.DMA((seq_tile,)),           # one sem per row DMA
            ]),
        compiler_params=pltpu.CompilerParams(
            dimension_semantics=("parallel", "parallel")),
        cost_estimate=cost,
    )(ids, w, p, g, beta)

    embedding_output = out[..., :H] if H_pad != H else out

    # attention_mask = ones(B, S)  =>  (1 - mask) * -10000 == 0 exactly.
    extended_attention_mask = jnp.zeros((B, 1, 1, S), dtype=jnp.float32)

    # TODO(synk): nn.Dropout(hidden_dropout_prob) is identity (inference mode).
    return embedding_output, extended_attention_mask


# ------------------------------ reference ---------------------------------- #
def _reference(input_ids, word_emb, pos_emb, ln_gamma, ln_beta):
    B, S = input_ids.shape
    words = word_emb[input_ids]                                   # (B,S,H)
    pos = pos_emb[jnp.arange(S)]                                  # (S,H)
    x = words + pos[None, :, :]
    mean = jnp.mean(x, axis=-1, keepdims=True)
    var = jnp.mean((x - mean) ** 2, axis=-1, keepdims=True)
    y = (x - mean) / jnp.sqrt(var + 1e-12)
    emb = y * ln_gamma + ln_beta
    mask = jnp.ones((B, S), jnp.float32)
    ext = (1.0 - mask)[:, None, None, :] * -10000.0
    return emb, ext


# --------------------------------- main ------------------------------------ #
if __name__ == "__main__":
    # config: vocab_size=64, hidden_size=128, max_position_embeddings=16
    B, S, H = 2, 8, 128
    VOCAB, MAX_POS = 64, 16

    key = jax.random.PRNGKey(0)
    k_w, k_p, k_ids = jax.random.split(key, 3)

    word_emb = 0.02 * jax.random.normal(k_w, (VOCAB, H), dtype=jnp.float32)
    word_emb = word_emb.at[0].set(0.0)          # padding_idx=0 row is zero
    pos_emb = 0.02 * jax.random.normal(k_p, (MAX_POS, H), dtype=jnp.float32)
    ln_gamma = jnp.ones((H,), dtype=jnp.float32)
    ln_beta = jnp.zeros((H,), dtype=jnp.float32)

    input_ids = jax.random.randint(k_ids, (B, S), 0, VOCAB, dtype=jnp.int32)

    emb, ext_mask = bert_embeddings_for_roc(
        input_ids, word_emb, pos_emb, ln_gamma, ln_beta)
    jax.block_until_ready(emb)
    jax.block_until_ready(ext_mask)

    emb_ref, ext_ref = _reference(input_ids, word_emb, pos_emb, ln_gamma, ln_beta)
    assert emb.shape == (B, S, H) and ext_mask.shape == (B, 1, 1, S)
    assert jnp.allclose(emb, emb_ref, atol=1e-5, rtol=1e-5)
    assert jnp.allclose(ext_mask, ext_ref)

    print("KERNEL_OK")
</pallas_src>

<mosaic_0001>
module attributes {stable_mosaic.version = 11 : i64} {
  func.func @_embed_ln_kernel(%arg0: i32, %arg1: i32, %arg2: memref<2x8xi32, #tpu.memory_space<smem>>, %arg3: memref<64x128xf32, #tpu.memory_space<any>>, %arg4: memref<8x128xf32, #tpu.memory_space<vmem>>, %arg5: memref<1x128xf32, #tpu.memory_space<vmem>>, %arg6: memref<1x128xf32, #tpu.memory_space<vmem>>, %arg7: memref<1x8x128xf32, #tpu.memory_space<vmem>>, %arg8: memref<8x128xf32, #tpu.memory_space<vmem>>, %arg9: memref<8x!tpu.dma_semaphore, #tpu.memory_space<semaphore_mem>>) attributes {dimension_semantics = [#tpu.dimension_semantics<parallel>, #tpu.dimension_semantics<parallel>], iteration_bounds = array<i64: 2, 1>, scalar_prefetch = 1 : i64, scratch_operands = 2 : i64, tpu.core_type = #tpu.core_type<tc>, window_params = [{}, {transform_indices = @transform_1, window_bounds = array<i64: 8, 128>}, {pipeline_mode = #tpu.pipeline_mode<synchronous>, transform_indices = @transform_2, window_bounds = array<i64: 1, 128>}, {pipeline_mode = #tpu.pipeline_mode<synchronous>, transform_indices = @transform_3, window_bounds = array<i64: 1, 128>}, {transform_indices = @transform_4, window_bounds = array<i64: 1, 8, 128>}]} {
    %c8_i32 = arith.constant 8 : i32
    %0 = arith.muli %arg1, %c8_i32 : i32
    %c0_i32 = arith.constant 0 : i32
    %1 = arith.addi %0, %c0_i32 : i32
    %2 = arith.index_cast %arg0 : i32 to index
    %3 = arith.index_cast %1 : i32 to index
    %4 = memref.load %arg2[%2, %3] : memref<2x8xi32, #tpu.memory_space<smem>>
    %c0_i32_0 = arith.constant 0 : i32
    %c63_i32 = arith.constant 63 : i32
    %5 = arith.maxsi %c0_i32_0, %4 : i32
    %6 = arith.minsi %c63_i32, %5 : i32
    %c0_i32_1 = arith.constant 0 : i32
    %c0_i32_2 = arith.constant 0 : i32
    %7 = tpu.memref_slice %arg3[%6, %c0_i32_2] : memref<64x128xf32, #tpu.memory_space<any>> -> memref<1x128xf32, #tpu.memory_space<any>>
    %c0_i32_3 = arith.constant 0 : i32
    %c0_i32_4 = arith.constant 0 : i32
    %8 = tpu.memref_slice %arg8[%c0_i32_3, %c0_i32_4] : memref<8x128xf32, #tpu.memory_space<vmem>> -> memref<1x128xf32, #tpu.memory_space<vmem>>
    %9 = tpu.memref_slice %arg9[%c0_i32_1] : memref<8x!tpu.dma_semaphore, #tpu.memory_space<semaphore_mem>> -> memref<1x!tpu.dma_semaphore, #tpu.memory_space<semaphore_mem>>
    %10 = tpu.memref_squeeze %9 : memref<1x!tpu.dma_semaphore, #tpu.memory_space<semaphore_mem>> -> memref<!tpu.dma_semaphore, #tpu.memory_space<semaphore_mem>>
    tpu.enqueue_dma source(%7 : memref<1x128xf32, #tpu.memory_space<any>>) target(%8 : memref<1x128xf32, #tpu.memory_space<vmem>>) target_semaphore(%10 : memref<!tpu.dma_semaphore, #tpu.memory_space<semaphore_mem>>)
    %c1_i32 = arith.constant 1 : i32
    %11 = arith.addi %0, %c1_i32 : i32
    %12 = arith.index_cast %arg0 : i32 to index
    %13 = arith.index_cast %11 : i32 to index
    %14 = memref.load %arg2[%12, %13] : memref<2x8xi32, #tpu.memory_space<smem>>
    %c0_i32_5 = arith.constant 0 : i32
    %c63_i32_6 = arith.constant 63 : i32
    %15 = arith.maxsi %c0_i32_5, %14 : i32
    %16 = arith.minsi %c63_i32_6, %15 : i32
    %c1_i32_7 = arith.constant 1 : i32
    %c0_i32_8 = arith.constant 0 : i32
    %17 = tpu.memref_slice %arg3[%16, %c0_i32_8] : memref<64x128xf32, #tpu.memory_space<any>> -> memref<1x128xf32, #tpu.memory_space<any>>
    %c1_i32_9 = arith.constant 1 : i32
    %c0_i32_10 = arith.constant 0 : i32
    %18 = tpu.memref_slice %arg8[%c1_i32_9, %c0_i32_10] : memref<8x128xf32, #tpu.memory_space<vmem>> -> memref<1x128xf32, #tpu.memory_space<vmem>>
    %19 = tpu.memref_slice %arg9[%c1_i32_7] : memref<8x!tpu.dma_semaphore, #tpu.memory_space<semaphore_mem>> -> memref<1x!tpu.dma_semaphore, #tpu.memory_space<semaphore_mem>>
    %20 = tpu.memref_squeeze %19 : memref<1x!tpu.dma_semaphore, #tpu.memory_space<semaphore_mem>> -> memref<!tpu.dma_semaphore, #tpu.memory_space<semaphore_mem>>
    tpu.enqueue_dma source(%17 : memref<1x128xf32, #tpu.memory_space<any>>) target(%18 : memref<1x128xf32, #tpu.memory_space<vmem>>) target_semaphore(%20 : memref<!tpu.dma_semaphore, #tpu.memory_space<semaphore_mem>>)
    %c2_i32 = arith.constant 2 : i32
    %21 = arith.addi %0, %c2_i32 : i32
    %22 = arith.index_cast %arg0 : i32 to index
    %23 = arith.index_cast %21 : i32 to index
    %24 = memref.load %arg2[%22, %23] : memref<2x8xi32, #tpu.memory_space<smem>>
    %c0_i32_11 = arith.constant 0 : i32
    %c63_i32_12 = arith.constant 63 : i32
    %25 = arith.maxsi %c0_i32_11, %24 : i32
    %26 = arith.minsi %c63_i32_12, %25 : i32
    %c2_i32_13 = arith.constant 2 : i32
    %c0_i32_14 = arith.constant 0 : i32
    %27 = tpu.memref_slice %arg3[%26, %c0_i32_14] : memref<64x128xf32, #tpu.memory_space<any>> -> memref<1x128xf32, #tpu.memory_space<any>>
    %c2_i32_15 = arith.constant 2 : i32
    %c0_i32_16 = arith.constant 0 : i32
    %28 = tpu.memref_slice %arg8[%c2_i32_15, %c0_i32_16] : memref<8x128xf32, #tpu.memory_space<vmem>> -> memref<1x128xf32, #tpu.memory_space<vmem>>
    %29 = tpu.memref_slice %arg9[%c2_i32_13] : memref<8x!tpu.dma_semaphore, #tpu.memory_space<semaphore_mem>> -> memref<1x!tpu.dma_semaphore, #tpu.memory_space<semaphore_mem>>
    %30 = tpu.memref_squeeze %29 : memref<1x!tpu.dma_semaphore, #tpu.memory_space<semaphore_mem>> -> memref<!tpu.dma_semaphore, #tpu.memory_space<semaphore_mem>>
    tpu.enqueue_dma source(%27 : memref<1x128xf32, #tpu.memory_space<any>>) target(%28 : memref<1x128xf32, #tpu.memory_space<vmem>>) target_semaphore(%30 : memref<!tpu.dma_semaphore, #tpu.memory_space<semaphore_mem>>)
    %c3_i32 = arith.constant 3 : i32
    %31 = arith.addi %0, %c3_i32 : i32
    %32 = arith.index_cast %arg0 : i32 to index
    %33 = arith.index_cast %31 : i32 to index
    %34 = memref.load %arg2[%32, %33] : memref<2x8xi32, #tpu.memory_space<smem>>
    %c0_i32_17 = arith.constant 0 : i32
    %c63_i32_18 = arith.constant 63 : i32
    %35 = arith.maxsi %c0_i32_17, %34 : i32
    %36 = arith.minsi %c63_i32_18, %35 : i32
    %c3_i32_19 = arith.constant 3 : i32
    %c0_i32_20 = arith.constant 0 : i32
    %37 = tpu.memref_slice %arg3[%36, %c0_i32_20] : memref<64x128xf32, #tpu.memory_space<any>> -> memref<1x128xf32, #tpu.memory_space<any>>
    %c3_i32_21 = arith.constant 3 : i32
    %c0_i32_22 = arith.constant 0 : i32
    %38 = tpu.memref_slice %arg8[%c3_i32_21, %c0_i32_22] : memref<8x128xf32, #tpu.memory_space<vmem>> -> memref<1x128xf32, #tpu.memory_space<vmem>>
    %39 = tpu.memref_slice %arg9[%c3_i32_19] : memref<8x!tpu.dma_semaphore, #tpu.memory_space<semaphore_mem>> -> memref<1x!tpu.dma_semaphore, #tpu.memory_space<semaphore_mem>>
    %40 = tpu.memref_squeeze %39 : memref<1x!tpu.dma_semaphore, #tpu.memory_space<semaphore_mem>> -> memref<!tpu.dma_semaphore, #tpu.memory_space<semaphore_mem>>
    tpu.enqueue_dma source(%37 : memref<1x128xf32, #tpu.memory_space<any>>) target(%38 : memref<1x128xf32, #tpu.memory_space<vmem>>) target_semaphore(%40 : memref<!tpu.dma_semaphore, #tpu.memory_space<semaphore_mem>>)
    %c4_i32 = arith.constant 4 : i32
    %41 = arith.addi %0, %c4_i32 : i32
    %42 = arith.index_cast %arg0 : i32 to index
    %43 = arith.index_cast %41 : i32 to index
    %44 = memref.load %arg2[%42, %43] : memref<2x8xi32, #tpu.memory_space<smem>>
    %c0_i32_23 = arith.constant 0 : i32
    %c63_i32_24 = arith.constant 63 : i32
    %45 = arith.maxsi %c0_i32_23, %44 : i32
    %46 = arith.minsi %c63_i32_24, %45 : i32
    %c4_i32_25 = arith.constant 4 : i32
    %c0_i32_26 = arith.constant 0 : i32
    %47 = tpu.memref_slice %arg3[%46, %c0_i32_26] : memref<64x128xf32, #tpu.memory_space<any>> -> memref<1x128xf32, #tpu.memory_space<any>>
    %c4_i32_27 = arith.constant 4 : i32
    %c0_i32_28 = arith.constant 0 : i32
    %48 = tpu.memref_slice %arg8[%c4_i32_27, %c0_i32_28] : memref<8x128xf32, #tpu.memory_space<vmem>> -> memref<1x128xf32, #tpu.memory_space<vmem>>
    %49 = tpu.memref_slice %arg9[%c4_i32_25] : memref<8x!tpu.dma_semaphore, #tpu.memory_space<semaphore_mem>> -> memref<1x!tpu.dma_semaphore, #tpu.memory_space<semaphore_mem>>
    %50 = tpu.memref_squeeze %49 : memref<1x!tpu.dma_semaphore, #tpu.memory_space<semaphore_mem>> -> memref<!tpu.dma_semaphore, #tpu.memory_space<semaphore_mem>>
    tpu.enqueue_dma source(%47 : memref<1x128xf32, #tpu.memory_space<any>>) target(%48 : memref<1x128xf32, #tpu.memory_space<vmem>>) target_semaphore(%50 : memref<!tpu.dma_semaphore, #tpu.memory_space<semaphore_mem>>)
    %c5_i32 = arith.constant 5 : i32
    %51 = arith.addi %0, %c5_i32 : i32
    %52 = arith.index_cast %arg0 : i32 to index
    %53 = arith.index_cast %51 : i32 to index
    %54 = memref.load %arg2[%52, %53] : memref<2x8xi32, #tpu.memory_space<smem>>
    %c0_i32_29 = arith.constant 0 : i32
    %c63_i32_30 = arith.constant 63 : i32
    %55 = arith.maxsi %c0_i32_29, %54 : i32
    %56 = arith.minsi %c63_i32_30, %55 : i32
    %c5_i32_31 = arith.constant 5 : i32
    %c0_i32_32 = arith.constant 0 : i32
    %57 = tpu.memref_slice %arg3[%56, %c0_i32_32] : memref<64x128xf32, #tpu.memory_space<any>> -> memref<1x128xf32, #tpu.memory_space<any>>
    %c5_i32_33 = arith.constant 5 : i32
    %c0_i32_34 = arith.constant 0 : i32
    %58 = tpu.memref_slice %arg8[%c5_i32_33, %c0_i32_34] : memref<8x128xf32, #tpu.memory_space<vmem>> -> memref<1x128xf32, #tpu.memory_space<vmem>>
    %59 = tpu.memref_slice %arg9[%c5_i32_31] : memref<8x!tpu.dma_semaphore, #tpu.memory_space<semaphore_mem>> -> memref<1x!tpu.dma_semaphore, #tpu.memory_space<semaphore_mem>>
    %60 = tpu.memref_squeeze %59 : memref<1x!tpu.dma_semaphore, #tpu.memory_space<semaphore_mem>> -> memref<!tpu.dma_semaphore, #tpu.memory_space<semaphore_mem>>
    tpu.enqueue_dma source(%57 : memref<1x128xf32, #tpu.memory_space<any>>) target(%58 : memref<1x128xf32, #tpu.memory_space<vmem>>) target_semaphore(%60 : memref<!tpu.dma_semaphore, #tpu.memory_space<semaphore_mem>>)
    %c6_i32 = arith.constant 6 : i32
    %61 = arith.addi %0, %c6_i32 : i32
    %62 = arith.index_cast %arg0 : i32 to index
    %63 = arith.index_cast %61 : i32 to index
    %64 = memref.load %arg2[%62, %63] : memref<2x8xi32, #tpu.memory_space<smem>>
    %c0_i32_35 = arith.constant 0 : i32
    %c63_i32_36 = arith.constant 63 : i32
    %65 = arith.maxsi %c0_i32_35, %64 : i32
    %66 = arith.minsi %c63_i32_36, %65 : i32
    %c6_i32_37 = arith.constant 6 : i32
    %c0_i32_38 = arith.constant 0 : i32
    %67 = tpu.memref_slice %arg3[%66, %c0_i32_38] : memref<64x128xf32, #tpu.memory_space<any>> -> memref<1x128xf32, #tpu.memory_space<any>>
    %c6_i32_39 = arith.constant 6 : i32
    %c0_i32_40 = arith.constant 0 : i32
    %68 = tpu.memref_slice %arg8[%c6_i32_39, %c0_i32_40] : memref<8x128xf32, #tpu.memory_space<vmem>> -> memref<1x128xf32, #tpu.memory_space<vmem>>
    %69 = tpu.memref_slice %arg9[%c6_i32_37] : memref<8x!tpu.dma_semaphore, #tpu.memory_space<semaphore_mem>> -> memref<1x!tpu.dma_semaphore, #tpu.memory_space<semaphore_mem>>
    %70 = tpu.memref_squeeze %69 : memref<1x!tpu.dma_semaphore, #tpu.memory_space<semaphore_mem>> -> memref<!tpu.dma_semaphore, #tpu.memory_space<semaphore_mem>>
    tpu.enqueue_dma source(%67 : memref<1x128xf32, #tpu.memory_space<any>>) target(%68 : memref<1x128xf32, #tpu.memory_space<vmem>>) target_semaphore(%70 : memref<!tpu.dma_semaphore, #tpu.memory_space<semaphore_mem>>)
    %c7_i32 = arith.constant 7 : i32
    %71 = arith.addi %0, %c7_i32 : i32
    %72 = arith.index_cast %arg0 : i32 to index
    %73 = arith.index_cast %71 : i32 to index
    %74 = memref.load %arg2[%72, %73] : memref<2x8xi32, #tpu.memory_space<smem>>
    %c0_i32_41 = arith.constant 0 : i32
    %c63_i32_42 = arith.constant 63 : i32
    %75 = arith.maxsi %c0_i32_41, %74 : i32
    %76 = arith.minsi %c63_i32_42, %75 : i32
    %c7_i32_43 = arith.constant 7 : i32
    %c0_i32_44 = arith.constant 0 : i32
    %77 = tpu.memref_slice %arg3[%76, %c0_i32_44] : memref<64x128xf32, #tpu.memory_space<any>> -> memref<1x128xf32, #tpu.memory_space<any>>
    %c7_i32_45 = arith.constant 7 : i32
    %c0_i32_46 = arith.constant 0 : i32
    %78 = tpu.memref_slice %arg8[%c7_i32_45, %c0_i32_46] : memref<8x128xf32, #tpu.memory_space<vmem>> -> memref<1x128xf32, #tpu.memory_space<vmem>>
    %79 = tpu.memref_slice %arg9[%c7_i32_43] : memref<8x!tpu.dma_semaphore, #tpu.memory_space<semaphore_mem>> -> memref<1x!tpu.dma_semaphore, #tpu.memory_space<semaphore_mem>>
    %80 = tpu.memref_squeeze %79 : memref<1x!tpu.dma_semaphore, #tpu.memory_space<semaphore_mem>> -> memref<!tpu.dma_semaphore, #tpu.memory_space<semaphore_mem>>
    tpu.enqueue_dma source(%77 : memref<1x128xf32, #tpu.memory_space<any>>) target(%78 : memref<1x128xf32, #tpu.memory_space<vmem>>) target_semaphore(%80 : memref<!tpu.dma_semaphore, #tpu.memory_space<semaphore_mem>>)
    %c0_i32_47 = arith.constant 0 : i32
    %c0_i32_48 = arith.constant 0 : i32
    %81 = tpu.memref_slice %arg3[%6, %c0_i32_48] : memref<64x128xf32, #tpu.memory_space<any>> -> memref<1x128xf32, #tpu.memory_space<any>>
    %c0_i32_49 = arith.constant 0 : i32
    %c0_i32_50 = arith.constant 0 : i32
    %82 = tpu.memref_slice %arg8[%c0_i32_49, %c0_i32_50] : memref<8x128xf32, #tpu.memory_space<vmem>> -> memref<1x128xf32, #tpu.memory_space<vmem>>
    %83 = tpu.memref_slice %arg9[%c0_i32_47] : memref<8x!tpu.dma_semaphore, #tpu.memory_space<semaphore_mem>> -> memref<1x!tpu.dma_semaphore, #tpu.memory_space<semaphore_mem>>
    %84 = tpu.memref_squeeze %83 : memref<1x!tpu.dma_semaphore, #tpu.memory_space<semaphore_mem>> -> memref<!tpu.dma_semaphore, #tpu.memory_space<semaphore_mem>>
    tpu.wait_dma2 semaphore(%84 : memref<!tpu.dma_semaphore, #tpu.memory_space<semaphore_mem>>) src(%81 : memref<1x128xf32, #tpu.memory_space<any>>) dst(%82 : memref<1x128xf32, #tpu.memory_space<vmem>>)
    %c1_i32_51 = arith.constant 1 : i32
    %c0_i32_52 = arith.constant 0 : i32
    %85 = tpu.memref_slice %arg3[%16, %c0_i32_52] : memref<64x128xf32, #tpu.memory_space<any>> -> memref<1x128xf32, #tpu.memory_space<any>>
    %c1_i32_53 = arith.constant 1 : i32
    %c0_i32_54 = arith.constant 0 : i32
    %86 = tpu.memref_slice %arg8[%c1_i32_53, %c0_i32_54] : memref<8x128xf32, #tpu.memory_space<vmem>> -> memref<1x128xf32, #tpu.memory_space<vmem>>
    %87 = tpu.memref_slice %arg9[%c1_i32_51] : memref<8x!tpu.dma_semaphore, #tpu.memory_space<semaphore_mem>> -> memref<1x!tpu.dma_semaphore, #tpu.memory_space<semaphore_mem>>
    %88 = tpu.memref_squeeze %87 : memref<1x!tpu.dma_semaphore, #tpu.memory_space<semaphore_mem>> -> memref<!tpu.dma_semaphore, #tpu.memory_space<semaphore_mem>>
    tpu.wait_dma2 semaphore(%88 : memref<!tpu.dma_semaphore, #tpu.memory_space<semaphore_mem>>) src(%85 : memref<1x128xf32, #tpu.memory_space<any>>) dst(%86 : memref<1x128xf32, #tpu.memory_space<vmem>>)
    %c2_i32_55 = arith.constant 2 : i32
    %c0_i32_56 = arith.constant 0 : i32
    %89 = tpu.memref_slice %arg3[%26, %c0_i32_56] : memref<64x128xf32, #tpu.memory_space<any>> -> memref<1x128xf32, #tpu.memory_space<any>>
    %c2_i32_57 = arith.constant 2 : i32
    %c0_i32_58 = arith.constant 0 : i32
    %90 = tpu.memref_slice %arg8[%c2_i32_57, %c0_i32_58] : memref<8x128xf32, #tpu.memory_space<vmem>> -> memref<1x128xf32, #tpu.memory_space<vmem>>
    %91 = tpu.memref_slice %arg9[%c2_i32_55] : memref<8x!tpu.dma_semaphore, #tpu.memory_space<semaphore_mem>> -> memref<1x!tpu.dma_semaphore, #tpu.memory_space<semaphore_mem>>
    %92 = tpu.memref_squeeze %91 : memref<1x!tpu.dma_semaphore, #tpu.memory_space<semaphore_mem>> -> memref<!tpu.dma_semaphore, #tpu.memory_space<semaphore_mem>>
    tpu.wait_dma2 semaphore(%92 : memref<!tpu.dma_semaphore, #tpu.memory_space<semaphore_mem>>) src(%89 : memref<1x128xf32, #tpu.memory_space<any>>) dst(%90 : memref<1x128xf32, #tpu.memory_space<vmem>>)
    %c3_i32_59 = arith.constant 3 : i32
    %c0_i32_60 = arith.constant 0 : i32
    %93 = tpu.memref_slice %arg3[%36, %c0_i32_60] : memref<64x128xf32, #tpu.memory_space<any>> -> memref<1x128xf32, #tpu.memory_space<any>>
    %c3_i32_61 = arith.constant 3 : i32
    %c0_i32_62 = arith.constant 0 : i32
    %94 = tpu.memref_slice %arg8[%c3_i32_61, %c0_i32_62] : memref<8x128xf32, #tpu.memory_space<vmem>> -> memref<1x128xf32, #tpu.memory_space<vmem>>
    %95 = tpu.memref_slice %arg9[%c3_i32_59] : memref<8x!tpu.dma_semaphore, #tpu.memory_space<semaphore_mem>> -> memref<1x!tpu.dma_semaphore, #tpu.memory_space<semaphore_mem>>
    %96 = tpu.memref_squeeze %95 : memref<1x!tpu.dma_semaphore, #tpu.memory_space<semaphore_mem>> -> memref<!tpu.dma_semaphore, #tpu.memory_space<semaphore_mem>>
    tpu.wait_dma2 semaphore(%96 : memref<!tpu.dma_semaphore, #tpu.memory_space<semaphore_mem>>) src(%93 : memref<1x128xf32, #tpu.memory_space<any>>) dst(%94 : memref<1x128xf32, #tpu.memory_space<vmem>>)
    %c4_i32_63 = arith.constant 4 : i32
    %c0_i32_64 = arith.constant 0 : i32
    %97 = tpu.memref_slice %arg3[%46, %c0_i32_64] : memref<64x128xf32, #tpu.memory_space<any>> -> memref<1x128xf32, #tpu.memory_space<any>>
    %c4_i32_65 = arith.constant 4 : i32
    %c0_i32_66 = arith.constant 0 : i32
    %98 = tpu.memref_slice %arg8[%c4_i32_65, %c0_i32_66] : memref<8x128xf32, #tpu.memory_space<vmem>> -> memref<1x128xf32, #tpu.memory_space<vmem>>
    %99 = tpu.memref_slice %arg9[%c4_i32_63] : memref<8x!tpu.dma_semaphore, #tpu.memory_space<semaphore_mem>> -> memref<1x!tpu.dma_semaphore, #tpu.memory_space<semaphore_mem>>
    %100 = tpu.memref_squeeze %99 : memref<1x!tpu.dma_semaphore, #tpu.memory_space<semaphore_mem>> -> memref<!tpu.dma_semaphore, #tpu.memory_space<semaphore_mem>>
    tpu.wait_dma2 semaphore(%100 : memref<!tpu.dma_semaphore, #tpu.memory_space<semaphore_mem>>) src(%97 : memref<1x128xf32, #tpu.memory_space<any>>) dst(%98 : memref<1x128xf32, #tpu.memory_space<vmem>>)
    %c5_i32_67 = arith.constant 5 : i32
    %c0_i32_68 = arith.constant 0 : i32
    %101 = tpu.memref_slice %arg3[%56, %c0_i32_68] : memref<64x128xf32, #tpu.memory_space<any>> -> memref<1x128xf32, #tpu.memory_space<any>>
    %c5_i32_69 = arith.constant 5 : i32
    %c0_i32_70 = arith.constant 0 : i32
    %102 = tpu.memref_slice %arg8[%c5_i32_69, %c0_i32_70] : memref<8x128xf32, #tpu.memory_space<vmem>> -> memref<1x128xf32, #tpu.memory_space<vmem>>
    %103 = tpu.memref_slice %arg9[%c5_i32_67] : memref<8x!tpu.dma_semaphore, #tpu.memory_space<semaphore_mem>> -> memref<1x!tpu.dma_semaphore, #tpu.memory_space<semaphore_mem>>
    %104 = tpu.memref_squeeze %103 : memref<1x!tpu.dma_semaphore, #tpu.memory_space<semaphore_mem>> -> memref<!tpu.dma_semaphore, #tpu.memory_space<semaphore_mem>>
    tpu.wait_dma2 semaphore(%104 : memref<!tpu.dma_semaphore, #tpu.memory_space<semaphore_mem>>) src(%101 : memref<1x128xf32, #tpu.memory_space<any>>) dst(%102 : memref<1x128xf32, #tpu.memory_space<vmem>>)
    %c6_i32_71 = arith.constant 6 : i32
    %c0_i32_72 = arith.constant 0 : i32
    %105 = tpu.memref_slice %arg3[%66, %c0_i32_72] : memref<64x128xf32, #tpu.memory_space<any>> -> memref<1x128xf32, #tpu.memory_space<any>>
    %c6_i32_73 = arith.constant 6 : i32
    %c0_i32_74 = arith.constant 0 : i32
    %106 = tpu.memref_slice %arg8[%c6_i32_73, %c0_i32_74] : memref<8x128xf32, #tpu.memory_space<vmem>> -> memref<1x128xf32, #tpu.memory_space<vmem>>
    %107 = tpu.memref_slice %arg9[%c6_i32_71] : memref<8x!tpu.dma_semaphore, #tpu.memory_space<semaphore_mem>> -> memref<1x!tpu.dma_semaphore, #tpu.memory_space<semaphore_mem>>
    %108 = tpu.memref_squeeze %107 : memref<1x!tpu.dma_semaphore, #tpu.memory_space<semaphore_mem>> -> memref<!tpu.dma_semaphore, #tpu.memory_space<semaphore_mem>>
    tpu.wait_dma2 semaphore(%108 : memref<!tpu.dma_semaphore, #tpu.memory_space<semaphore_mem>>) src(%105 : memref<1x128xf32, #tpu.memory_space<any>>) dst(%106 : memref<1x128xf32, #tpu.memory_space<vmem>>)
    %c7_i32_75 = arith.constant 7 : i32
    %c0_i32_76 = arith.constant 0 : i32
    %109 = tpu.memref_slice %arg3[%76, %c0_i32_76] : memref<64x128xf32, #tpu.memory_space<any>> -> memref<1x128xf32, #tpu.memory_space<any>>
    %c7_i32_77 = arith.constant 7 : i32
    %c0_i32_78 = arith.constant 0 : i32
    %110 = tpu.memref_slice %arg8[%c7_i32_77, %c0_i32_78] : memref<8x128xf32, #tpu.memory_space<vmem>> -> memref<1x128xf32, #tpu.memory_space<vmem>>
    %111 = tpu.memref_slice %arg9[%c7_i32_75] : memref<8x!tpu.dma_semaphore, #tpu.memory_space<semaphore_mem>> -> memref<1x!tpu.dma_semaphore, #tpu.memory_space<semaphore_mem>>
    %112 = tpu.memref_squeeze %111 : memref<1x!tpu.dma_semaphore, #tpu.memory_space<semaphore_mem>> -> memref<!tpu.dma_semaphore, #tpu.memory_space<semaphore_mem>>
    tpu.wait_dma2 semaphore(%112 : memref<!tpu.dma_semaphore, #tpu.memory_space<semaphore_mem>>) src(%109 : memref<1x128xf32, #tpu.memory_space<any>>) dst(%110 : memref<1x128xf32, #tpu.memory_space<vmem>>)
    %c0 = arith.constant 0 : index
    %c0_79 = arith.constant 0 : index
    %113 = vector.load %arg8[%c0, %c0_79] : memref<8x128xf32, #tpu.memory_space<vmem>>, vector<8x128xf32>
    %c0_80 = arith.constant 0 : index
    %c0_81 = arith.constant 0 : index
    %114 = vector.load %arg4[%c0_80, %c0_81] : memref<8x128xf32, #tpu.memory_space<vmem>>, vector<8x128xf32>
    %115 = arith.addf %113, %114 : vector<8x128xf32>
    %cst = arith.constant dense<0.000000e+00> : vector<8xf32>
    %116 = vector.multi_reduction <add>, %115, %cst [1] : vector<8x128xf32> to vector<8xf32>
    %117 = vector.shape_cast %116 : vector<8xf32> to vector<8x1xf32>
    %cst_82 = arith.constant 1.280000e+02 : f32
    %118 = vector.broadcast %cst_82 : f32 to vector<8x1xf32>
    %119 = arith.divf %117, %118 : vector<8x1xf32>
    %120 = vector.broadcast %119 : vector<8x1xf32> to vector<8x128xf32>
    %121 = arith.subf %115, %120 : vector<8x128xf32>
    %122 = arith.mulf %121, %121 : vector<8x128xf32>
    %cst_83 = arith.constant dense<0.000000e+00> : vector<8xf32>
    %123 = vector.multi_reduction <add>, %122, %cst_83 [1] : vector<8x128xf32> to vector<8xf32>
    %124 = vector.shape_cast %123 : vector<8xf32> to vector<8x1xf32>
    %cst_84 = arith.constant 1.280000e+02 : f32
    %125 = vector.broadcast %cst_84 : f32 to vector<8x1xf32>
    %126 = arith.divf %124, %125 : vector<8x1xf32>
    %cst_85 = arith.constant 9.99999996E-13 : f32
    %127 = vector.broadcast %cst_85 : f32 to vector<8x1xf32>
    %128 = arith.addf %126, %127 : vector<8x1xf32>
    %129 = math.rsqrt %128 : vector<8x1xf32>
    %130 = vector.broadcast %129 : vector<8x1xf32> to vector<8x128xf32>
    %131 = arith.mulf %121, %130 : vector<8x128xf32>
    %c0_86 = arith.constant 0 : index
    %c0_87 = arith.constant 0 : index
    %132 = vector.load %arg5[%c0_86, %c0_87] : memref<1x128xf32, #tpu.memory_space<vmem>>, vector<1x128xf32>
    %133 = vector.broadcast %132 : vector<1x128xf32> to vector<8x128xf32>
    %134 = arith.mulf %131, %133 : vector<8x128xf32>
    %c0_88 = arith.constant 0 : index
    %c0_89 = arith.constant 0 : index
    %135 = vector.load %arg6[%c0_88, %c0_89] : memref<1x128xf32, #tpu.memory_space<vmem>>, vector<1x128xf32>
    %136 = vector.broadcast %135 : vector<1x128xf32> to vector<8x128xf32>
    %137 = arith.addf %134, %136 : vector<8x128xf32>
    %c0_90 = arith.constant 0 : index
    %c0_91 = arith.constant 0 : index
    %c0_92 = arith.constant 0 : index
    %138 = vector.load %arg7[%c0_90, %c0_91, %c0_92] : memref<1x8x128xf32, #tpu.memory_space<vmem>>, vector<1x8x128xf32>
    %139 = vector.shape_cast %138 : vector<1x8x128xf32> to vector<8x128xf32>
    %140 = vector.shape_cast %137 : vector<8x128xf32> to vector<1x8x128xf32>
    tpu.vector_store %arg7[%c0_90, %c0_91, %c0_92], %140 {strides = array<i32>} : memref<1x8x128xf32, #tpu.memory_space<vmem>>, vector<1x8x128xf32>,
    return
  }
  func.func @transform_1(%arg0: i32, %arg1: i32, %arg2: memref<2x8xi32, #tpu.memory_space<smem>>) -> (i32, i32) {
    %c0_i32 = arith.constant 0 : i32
    %c0_i32_0 = arith.constant 0 : i32
    return %arg1, %c0_i32 : i32, i32
  }
  func.func @transform_2(%arg0: i32, %arg1: i32, %arg2: memref<2x8xi32, #tpu.memory_space<smem>>) -> (i32, i32) {
    %c0_i32 = arith.constant 0 : i32
    %c0_i32_0 = arith.constant 0 : i32
    %c0_i32_1 = arith.constant 0 : i32
    return %c0_i32, %c0_i32_0 : i32, i32
  }
  func.func @transform_3(%arg0: i32, %arg1: i32, %arg2: memref<2x8xi32, #tpu.memory_space<smem>>) -> (i32, i32) {
    %c0_i32 = arith.constant 0 : i32
    %c0_i32_0 = arith.constant 0 : i32
    %c0_i32_1 = arith.constant 0 : i32
    return %c0_i32, %c0_i32_0 : i32, i32
  }
  func.func @transform_4(%arg0: i32, %arg1: i32, %arg2: memref<2x8xi32, #tpu.memory_space<smem>>) -> (i32, i32, i32) {
    %c0_i32 = arith.constant 0 : i32
    %c0_i32_0 = arith.constant 0 : i32
    return %arg0, %arg1, %c0_i32 : i32, i32, i32
  }
}

</mosaic_0001>

<bundles_post_ra>
// kernel: tpu_custom_call.1
= control target key start
LH: loop header
LB: loop body
LE: loop exit
PB: predicated region body
PF: predicated region fallthrough
CT: control target
= control target key end

     0   :  { %s1497_s0 = inlined_call_operand.hbm [shape: s32[2,8], index: 0, kind: input, shape index: {}]   ;;  %s1498_s1 = inlined_call_operand.hbm [shape: f32[64,128], index: 1, kind: input, shape index: {}]   ;;  %s1499_s2 = inlined_call_operand.hbm [shape: f32[16,128], index: 2, kind: input, shape index: {}]   ;;  %s1500_s3 = inlined_call_operand.vmem [shape: f32[1,128], index: 3, kind: input, shape index: {}]   ;;  %s1501_s4 = inlined_call_operand.vmem [shape: f32[1,128], index: 4, kind: input, shape index: {}]   ;;  %s1502_s5 = inlined_call_operand.hbm [shape: f32[2,8,128], index: 5, kind: output, shape index: {}]  }
   0x1   :  { %1510 = sst [smem:[#allocation42_spill]] %s1499_s2  ;;  %s786_s20 = scalar_lea.hbm %s1497_s0, 32 }
   0x2   :  { %p787_p0 = scmp.ne.s32.totalorder %s1497_s0, %s786_s20  ;;  %p790_p1 = scmp.lt.u32.totalorder %s786_s20, %s1497_s0 }
   0x4   :  { %p792_p2 = pnand %p790_p1, %p787_p0 }
   0x6   :  { %795 = shalt.err (!%p792_p2)  }
   0x7   :  { %s1118_s25 = smov [#allocation5]  }
   0x8   :  { %11 = dma.hbm_to_smem %s1497_s0, 32, %s1118_s25, [#allocation4] }
   0x9   :  { %1068 = dma.done.wait [#allocation4], 32 }
   0xa   :  { %1069 = vsyncadd [#allocation4], 4294967264 }
   0xb   :  { %13 = sfence }
   0xc   :  { %14 = vsyncpa [#allocation7], 0 }
   0xd   :  { %15 = vsyncpa [#allocation8], 0 }
   0xe   :  { %17 = vsyncpa [#allocation8 + $0x1], 0  ;;  %s1171_s28 = smov 0   ;;  %s1173_s29 = smov 0  }
   0xf   :  { %s1175_s30 = smov 0   ;;  %s1177_s6 = smov 0  }
  0x10   :  { %s1179_s7 = smov 0   ;;  %s1181_s8 = smov 0  }
  0x11 LB: > { %1511 = sst [smem:[#allocation39_spill]] %s1112_s7  ;;  %s616_s0 = sadd.s32 4294967295, %s1116_s8   ;;  %s1116_s8 = sphi %s1181_s8, %s23_s8   ;;  %s1112_s7 = sphi %s1179_s7, %s1529_s7   ;;  %s1108_s6 = sphi %s1177_s6, %s1528_s6   ;;  %s1104_s30 = sphi %s1175_s30, %s1532_s30   ;;  %s1100_s29 = sphi %s1173_s29, %s1531_s29   ;;  %s1096_s28 = sphi %s1171_s28, %s1530_s28  }
  0x12   : > { %s617_s9 = sadd.s32 4294967294, %s1116_s8   ;;  %s35_s10 = sadd.s32 1, %s1112_s7 }
  0x13   : > { %s112_s11 = sadd.s32 1, %s1104_s30  ;;  %p37_p3 = scmp.ge.s32.totalorder %s35_s10, 2 }
  0x14   : > { %p122_p4 = scmp.ne.s32.totalorder %s1104_s30, %s1100_s29  ;;  %p123_p5 = scmp.eq.s32.totalorder %s616_s0, 1 }
  0x15   : > { %p128_p6 = scmp.ne.s32.totalorder %s1100_s29, %s1096_s28  ;;  %s1534_s10 = smov (%p37_p3, %s35_s10), 0 }
  0x16   : > { %1512 = sst [smem:[#allocation40_spill]] %s1534_s10  ;;  %p1211_p7 = por %p123_p5, %p122_p4 }
  0x17   : > { %p129_p8 = scmp.eq.s32.totalorder %s617_s9, 1  ;;  %s107_s13 = ssub.s32 %s1112_s7, %s1534_s10 }
  0x18   : > { %s1513_s12 = scalar_select %p1211_p7, 1, 0 }
  0x19   : > { %p618_p9 = scmp.ge.s32.totalorder %s1116_s8, 1  ;;  %p110_p10 = scmp.eq.s32.totalorder %s107_s13, 0 }
  0x1a   : > { %p1218_p11 = por %p129_p8, %p128_p6  ;;  %p136_p12 = scmp.lt.s32.totalorder %s1116_s8, 3 }
  0x1b   : > { %s1224_s15 = scalar_select %p110_p10, %s1104_s30, %s112_s11  }
  0x1c   : > { %s1514_s14 = scalar_select %p1218_p11, 1, 0 }
  0x1d   : > { %1515 = sst [smem:[#allocation41_spill]] %s1224_s15  ;;  %p1226_p13 = pnand %p618_p9, %p136_p12 }
  0x1e   : > { %p1230_p0 = scmp.eq.s32.totalorder %s616_s0, 0  ;;  %s1119_s18 = smov [#allocation6]  }
  0x1f   : > { %s1516_s16 = scalar_select %p1226_p13, 1, 0 }
  0x20   : > { %s1517_s17 = scalar_select %p1230_p0, 1, 0 }
  0x21   : > { %p715_p1 = pneg %p1226_p13  ;;  %s151_s19 = sshll.u32 %s1119_s18, 4  ;;  %s152_s19 = int_to_ptr.vmem [resolvable:$true] %s151_s19 }
  0x22   : > { %s1519_s2 = sld [smem:[#allocation42_spill]] }
  0x23   : > { %p1238_p2 = pnand %p1230_p0, %p715_p1 }
  0x25   : > { %p798_p4 = pneg %p1238_p2 }
  0x28   : > { %s796_s23 = scalar_lea.hbm %s1519_s2, 128  ;;  %s801_s0 = scalar_lea.hbm %s1519_s2, 256 }
  0x29   : > { %p797_p3 = scmp.ne.s32.totalorder %s1519_s2, %s796_s23  ;;  %p802_p8 = scmp.lt.u32.totalorder %s801_s0, %s796_s23 }
  0x2a   : > { %p803_p9 = scmp.lt.u32.totalorder %s796_s23, %s1519_s2 }
  0x2b   : > { %p799_p5 = pnand %p798_p4, %p797_p3 }
  0x2c   : > { %p804_p10 = por %p803_p9, %p802_p8 }
  0x2d   : > { %p800_p6 = pneg %p799_p5 }
  0x2f   : > { %p805_p12 = pnand %p804_p10, %p800_p6 }
  0x31   : > { %808 = shalt.err (!%p805_p12)
}
  0x32   : > { %s809_s13 = scalar_lea.vmem %s152_s19, 128  ;;  %p817_p0 = scmp.lt.s32.totalorder %s152_s19, %s152_s19 }
  0x33   : > { %p810_p1 = scmp.ne.s32.totalorder %s152_s19, %s809_s13  ;;  %p818_p13 = scmp.lt.s32.totalorder %s809_s13, %s809_s13 }
  0x35   : > { %p812_p11 = pnand %p810_p1, %p798_p4  ;;  %p819_p3 = por %p818_p13, %p817_p0 }
  0x37   : > { %p813_p7 = pneg %p812_p11 }
  0x39   : > { %p820_p5 = pnand %p819_p3, %p813_p7 }
  0x3b   : > { %823 = shalt.err (!%p820_p5)
}
  0x3c   : > { %718 = dma.hbm_to_vmem [thread:$0]  (!%p1238_p2), %s1519_s2, 128, %s152_s19, [#allocation7]  }
  0x3d   : > { %p1520_p8 = scmp.ne.s32.totalorder %s1516_s16, 0 }
  0x3e   : > { %p1521_p6 = scmp.ne.s32.totalorder (!%p1520_p8), %s1517_s17, 0 }
  0x3f   : > { %170 = sbr.rel (%p1520_p8) target bundleno = 624 (0x270), region = 32 }
  0x46   : > { %1071 = dma.done.wait (%p1521_p6), [#allocation7], 128  }
  0x47   : > { %1073 = vsyncadd (%p1521_p6), [#allocation7], 4294967168  ;;  %s1507_s22 = sand.u32 1, %s1100_s29   ;;  %s1269_s23 = sshll.u32 %s1108_s6, 7 }
  0x48   : > { %s1273_s19 = sshll.u32 %s1507_s22, 3  ;;  %s197_s16 = sld [smem:[#allocation5 + %s1269_s23]] }
  0x49   : > { %s1120_s20 = smov [#allocation2]   ;;  %s222_s25 = sadd.s32 1, %s1269_s23 }
  0x4a   : > { %s211_s24 = sshll.u32 %s1120_s20, 4  ;;  %s1279_s17 = sld [smem:[#allocation5 + %s222_s25]]  ;;  %s1277_s24 = int_to_ptr.vmem [resolvable:$true] %s211_s24 }
  0x4b   : > { %s250_s26 = sadd.s32 2, %s1269_s23  ;;  %s1121_s6 = smov [#allocation2 + $0x1]  }
  0x4c   : > { %s239_s27 = sshll.u32 %s1121_s6, 4  ;;  %s1282_s0 = sld [smem:[#allocation5 + %s250_s26]]  ;;  %s1284_s27 = int_to_ptr.vmem [resolvable:$true] %s239_s27 }
  0x4d   : > { %s1297_s6 = scalar_lea.hbm %s1498_s1, 1024 }
  0x4e   : > { %p198_p7 = scmp.gt.s32.totalorder %s197_s16, 0  ;;  %p624_p11 = scmp.lt.s32.totalorder %s197_s16, 63 }
  0x50   : > { %s1536_s16 = smov (!%p198_p7, %s197_s16), 0  ;;  %p224_p13 = scmp.gt.s32.totalorder %s1279_s17, 0 }
  0x51   : > { %p631_p0 = scmp.lt.s32.totalorder %s1279_s17, 63  ;;  %s1538_s16 = smov (!%p624_p11, %s1536_s16), 63 }
  0x52   : > { %s225_s9 = scalar_select %p224_p13, %s1279_s17, 0 }
  0x53   : > { %s629_s11 = sshll.u32 %s1538_s16, 4  ;;  %p252_p2 = scmp.gt.s32.totalorder %s1282_s0, 0 }
  0x54   : > { %s203_s21 = scalar_lea.hbm %s1498_s1, %s629_s11 }
  0x55   : > { %s824_s20 = scalar_lea.hbm %s203_s21, 16  ;;  %p827_p10 = scmp.lt.u32.totalorder %s203_s21, %s1498_s1 }
  0x56   : > { %p825_p9 = scmp.ne.s32.totalorder %s203_s21, %s824_s20  ;;  %p828_p12 = scmp.lt.u32.totalorder %s1297_s6, %s824_s20 }
  0x57   : > { %p830_p3 = scmp.lt.u32.totalorder %s824_s20, %s203_s21 }
  0x58   : > { %p829_p1 = por %p828_p12, %p827_p10 }
  0x5a   : > { %p831_p5 = por %p830_p3, %p829_p1 }
  0x5c   : > { %p832_p8 = pnand %p831_p5, %p825_p9 }
  0x5e   : > { %835 = shalt.err (!%p832_p8)  }
  0x5f   : > { %s836_s16 = scalar_lea.vmem %s1277_s24, 16  ;;  %s1306_s11 = scalar_lea.vmem %s1277_s24, 128 }
  0x60   : > { %p837_p6 = scmp.ne.s32.totalorder %s1277_s24, %s836_s16  ;;  %p841_p7 = scmp.lt.s32.totalorder %s1277_s24, %s1277_s24 }
  0x61   : > { %p842_p11 = scmp.lt.s32.totalorder %s1306_s11, %s836_s16 }
  0x63   : > { %p843_p13 = por %p842_p11, %p841_p7 }
  0x65   : > { %p844_p4 = pnand %p843_p13, %p837_p6 }
  0x67   : > { %847 = shalt.err (!%p844_p4)  }
  0x68   : > { %214 = dma.hbm_to_vmem [thread:$0]  %s203_s21, 16, %s1277_s24, [#allocation3] }
  0x69   : > { %s1540_s9 = smov (!%p631_p0, %s225_s9), 63  ;;  %s1122_s13 = smov [#allocation2 + $0x2]  }
  0x6a   : > { %s253_s2 = scalar_select %p252_p2, %s1282_s0, 0 }
  0x6b   : > { %s636_s22 = sshll.u32 %s1540_s9, 4  ;;  %s267_s18 = sshll.u32 %s1122_s13, 4  ;;  %s1320_s18 = int_to_ptr.vmem [resolvable:$true] %s267_s18 }
  0x6c   : > { %s229_s26 = scalar_lea.hbm %s1498_s1, %s636_s22 }
  0x6d   : > { %s848_s16 = scalar_lea.hbm %s229_s26, 16  ;;  %p851_p9 = scmp.lt.u32.totalorder %s229_s26, %s1498_s1 }
  0x6e   : > { %p849_p4 = scmp.ne.s32.totalorder %s229_s26, %s848_s16  ;;  %p852_p10 = scmp.lt.u32.totalorder %s1297_s6, %s848_s16 }
  0x6f   : > { %p854_p0 = scmp.lt.u32.totalorder %s848_s16, %s229_s26 }
  0x70   : > { %p853_p12 = por %p852_p10, %p851_p9 }
  0x72   : > { %p855_p1 = por %p854_p0, %p853_p12 }
  0x74   : > { %p856_p2 = pnand %p855_p1, %p849_p4 }
  0x76   : > { %859 = shalt.err (!%p856_p2)  }
  0x77   : > { %s860_s17 = scalar_lea.vmem %s1284_s27, 16  ;;  %p865_p5 = scmp.lt.s32.totalorder %s1284_s27, %s1277_s24 }
  0x78   : > { %p861_p3 = scmp.ne.s32.totalorder %s1284_s27, %s860_s17  ;;  %p866_p8 = scmp.lt.s32.totalorder %s1306_s11, %s860_s17 }
  0x7a   : > { %p867_p6 = por %p866_p8, %p865_p5 }
  0x7c   : > { %p868_p7 = pnand %p867_p6, %p861_p3 }
  0x7e   : > { %871 = shalt.err (!%p868_p7)  }
  0x7f   : > { %242 = dma.hbm_to_vmem [thread:$0]  %s229_s26, 16, %s1284_s27, [#allocation3 + $0x1] }
  0x80   : > { %p1522_p11 = scmp.lt.s32.totalorder %s1282_s0, 63  ;;  %s278_s7 = sadd.s32 3, %s1269_s23 }
  0x81   : > { %s1335_s9 = sld [smem:[#allocation5 + %s278_s7]] }
  0x82   : > { %s1542_s2 = smov (!%p1522_p11, %s253_s2), 63 }
  0x83   : > { %s643_s10 = sshll.u32 %s1542_s2, 4 }
  0x84   : > { %s257_s13 = scalar_lea.hbm %s1498_s1, %s643_s10 }
  0x85   : > { %s872_s20 = scalar_lea.hbm %s257_s13, 16  ;;  %p875_p4 = scmp.lt.u32.totalorder %s257_s13, %s1498_s1 }
  0x86   : > { %p873_p13 = scmp.ne.s32.totalorder %s257_s13, %s872_s20  ;;  %p876_p9 = scmp.lt.u32.totalorder %s1297_s6, %s872_s20 }
  0x87   : > { %p878_p12 = scmp.lt.u32.totalorder %s872_s20, %s257_s13 }
  0x88   : > { %p877_p10 = por %p876_p9, %p875_p4 }
  0x8a   : > { %p879_p0 = por %p878_p12, %p877_p10 }
  0x8c   : > { %p880_p1 = pnand %p879_p0, %p873_p13 }
  0x8e   : > { %883 = shalt.err (!%p880_p1)  }
  0x8f   : > { %s884_s27 = scalar_lea.vmem %s1320_s18, 16  ;;  %p889_p3 = scmp.lt.s32.totalorder %s1320_s18, %s1277_s24 }
  0x90   : > { %p885_p2 = scmp.ne.s32.totalorder %s1320_s18, %s884_s27  ;;  %p890_p5 = scmp.lt.s32.totalorder %s1306_s11, %s884_s27 }
  0x92   : > { %p891_p8 = por %p890_p5, %p889_p3 }
  0x94   : > { %p892_p6 = pnand %p891_p8, %p885_p2 }
  0x96   : > { %895 = shalt.err (!%p892_p6)  }
  0x97   : > { %270 = dma.hbm_to_vmem [thread:$0]  %s257_s13, 16, %s1320_s18, [#allocation3 + $0x2] }
  0x98   : > { %s1123_s0 = smov [#allocation2 + $0x3]   ;;  %s306_s26 = sadd.s32 4, %s1269_s23 }
  0x99   : > { %s295_s2 = sshll.u32 %s1123_s0, 4  ;;  %s1351_s17 = sld [smem:[#allocation5 + %s306_s26]]  ;;  %s296_s2 = int_to_ptr.vmem [resolvable:$true] %s295_s2 }
  0x9a   : > { %s1124_s7 = smov [#allocation2 + $0x4]   ;;  %s334_s21 = sadd.s32 5, %s1269_s23 }
  0x9b   : > { %s323_s10 = sshll.u32 %s1124_s7, 4  ;;  %p280_p7 = scmp.gt.s32.totalorder %s1335_s9, 0  ;;  %s1359_s10 = int_to_ptr.vmem [resolvable:$true] %s323_s10 }
  0x9c   : > { %p645_p11 = scmp.lt.s32.totalorder %s1335_s9, 63  ;;  %s1356_s22 = sld [smem:[#allocation5 + %s334_s21]] }
  0x9d   : > { %s1544_s9 = smov (!%p280_p7, %s1335_s9), 0  ;;  %s362_s18 = sadd.s32 6, %s1269_s23 }
  0x9e   : > { %s1546_s9 = smov (!%p645_p11, %s1544_s9), 63 }
  0x9f   : > { %p308_p13 = scmp.gt.s32.totalorder %s1351_s17, 0  ;;  %s650_s13 = sshll.u32 %s1546_s9, 4 }
  0xa0   : > { %s285_s16 = scalar_lea.hbm %s1498_s1, %s650_s13 }
  0xa1   : > { %s896_s27 = scalar_lea.hbm %s285_s16, 16  ;;  %p899_p12 = scmp.lt.u32.totalorder %s285_s16, %s1498_s1 }
  0xa2   : > { %p336_p9 = scmp.gt.s32.totalorder %s1356_s22, 0  ;;  %p897_p10 = scmp.ne.s32.totalorder %s285_s16, %s896_s27 }
  0xa3   : > { %p900_p0 = scmp.lt.u32.totalorder %s1297_s6, %s896_s27  ;;  %p902_p2 = scmp.lt.u32.totalorder %s896_s27, %s285_s16 }
  0xa5   : > { %p901_p1 = por %p900_p0, %p899_p12 }
  0xa7   : > { %p903_p3 = por %p902_p2, %p901_p1 }
  0xa9   : > { %p904_p5 = pnand %p903_p3, %p897_p10 }
  0xab   : > { %907 = shalt.err (!%p904_p5)  }
  0xac   : > { %s908_s7 = scalar_lea.vmem %s296_s2, 16  ;;  %p913_p6 = scmp.lt.s32.totalorder %s296_s2, %s1277_s24 }
  0xad   : > { %p909_p8 = scmp.ne.s32.totalorder %s296_s2, %s908_s7  ;;  %p914_p7 = scmp.lt.s32.totalorder %s1306_s11, %s908_s7 }
  0xaf   : > { %p915_p11 = por %p914_p7, %p913_p6 }
  0xb1   : > { %p916_p4 = pnand %p915_p11, %p909_p8 }
  0xb3   : > { %919 = shalt.err (!%p916_p4)  }
  0xb4   : > { %298 = dma.hbm_to_vmem [thread:$0]  %s285_s16, 16, %s296_s2, [#allocation3 + $0x3] }
  0xb5   : > { %s309_s9 = scalar_select %p308_p13, %s1351_s17, 0 }
  0xb6   : > { %s337_s21 = scalar_select %p336_p9, %s1356_s22, 0 }
  0xb7   : > { %p1523_p10 = scmp.lt.s32.totalorder %s1351_s17, 63  ;;  %p659_p12 = scmp.lt.s32.totalorder %s1356_s22, 63 }
  0xb8   : > { %s1125_s13 = smov [#allocation2 + $0x5]   ;;  %s1383_s27 = sld [smem:[#allocation5 + %s362_s18]] }
  0xb9   : > { %s1548_s9 = smov (!%p1523_p10, %s309_s9), 63  ;;  %s351_s20 = sshll.u32 %s1125_s13, 4  ;;  %s352_s20 = int_to_ptr.vmem [resolvable:$true] %s351_s20 }
  0xba   : > { %s657_s25 = sshll.u32 %s1548_s9, 4 }
  0xbb   : > { %s313_s0 = scalar_lea.hbm %s1498_s1, %s657_s25 }
  0xbc   : > { %s920_s26 = scalar_lea.hbm %s313_s0, 16  ;;  %p923_p13 = scmp.lt.u32.totalorder %s313_s0, %s1498_s1 }
  0xbd   : > { %p921_p4 = scmp.ne.s32.totalorder %s313_s0, %s920_s26  ;;  %p924_p0 = scmp.lt.u32.totalorder %s1297_s6, %s920_s26 }
  0xbe   : > { %p926_p1 = scmp.lt.u32.totalorder %s920_s26, %s313_s0 }
  0xbf   : > { %p925_p9 = por %p924_p0, %p923_p13 }
  0xc1   : > { %p927_p2 = por %p926_p1, %p925_p9 }
  0xc3   : > { %p928_p3 = pnand %p927_p2, %p921_p4 }
  0xc5   : > { %931 = shalt.err (!%p928_p3)  }
  0xc6   : > { %s932_s17 = scalar_lea.vmem %s1359_s10, 16  ;;  %p937_p8 = scmp.lt.s32.totalorder %s1359_s10, %s1277_s24 }
  0xc7   : > { %p933_p5 = scmp.ne.s32.totalorder %s1359_s10, %s932_s17  ;;  %p938_p6 = scmp.lt.s32.totalorder %s1306_s11, %s932_s17 }
  0xc9   : > { %p939_p7 = por %p938_p6, %p937_p8 }
  0xcb   : > { %p940_p11 = pnand %p939_p7, %p933_p5 }
  0xcd   : > { %943 = shalt.err (!%p940_p11)  }
  0xce   : > { %326 = dma.hbm_to_vmem [thread:$0]  %s313_s0, 16, %s1359_s10, [#allocation3 + $0x4] }
  0xcf   : > { %s1550_s21 = smov (!%p659_p12, %s337_s21), 63  ;;  %s1126_s15 = smov [#allocation2 + $0x6]  }
  0xd0   : > { %s379_s18 = sshll.u32 %s1126_s15, 4  ;;  %s664_s9 = sshll.u32 %s1550_s21, 4  ;;  %s380_s18 = int_to_ptr.vmem [resolvable:$true] %s379_s18 }
  0xd1   : > { %s390_s13 = sadd.s32 7, %s1269_s23  ;;  %s341_s16 = scalar_lea.hbm %s1498_s1, %s664_s9 }
  0xd2   : > { %p364_p10 = scmp.gt.s32.totalorder %s1383_s27, 0  ;;  %s944_s26 = scalar_lea.hbm %s341_s16, 16 }
  0xd3   : > { %p945_p4 = scmp.ne.s32.totalorder %s341_s16, %s944_s26  ;;  %p947_p13 = scmp.lt.u32.totalorder %s341_s16, %s1498_s1 }
  0xd4   : > { %p948_p0 = scmp.lt.u32.totalorder %s1297_s6, %s944_s26  ;;  %p950_p1 = scmp.lt.u32.totalorder %s944_s26, %s341_s16 }
  0xd6   : > { %p949_p9 = por %p948_p0, %p947_p13 }
  0xd8   : > { %p951_p12 = por %p950_p1, %p949_p9 }
  0xda   : > { %p952_p2 = pnand %p951_p12, %p945_p4 }
  0xdc   : > { %955 = shalt.err (!%p952_p2)  }
  0xdd   : > { %s956_s10 = scalar_lea.vmem %s352_s20, 16  ;;  %p961_p5 = scmp.lt.s32.totalorder %s352_s20, %s1277_s24 }
  0xde   : > { %p957_p3 = scmp.ne.s32.totalorder %s352_s20, %s956_s10  ;;  %p962_p8 = scmp.lt.s32.totalorder %s1306_s11, %s956_s10 }
  0xe0   : > { %p963_p6 = por %p962_p8, %p961_p5 }
  0xe2   : > { %p964_p7 = pnand %p963_p6, %p957_p3 }
  0xe4   : > { %967 = shalt.err (!%p964_p7)  }
  0xe5   : > { %354 = dma.hbm_to_vmem [thread:$0]  %s341_s16, 16, %s352_s20, [#allocation3 + $0x5] }
  0xe6   : > { %s365_s22 = scalar_select %p364_p10, %s1383_s27, 0 }
  0xe7   : > { %p666_p11 = scmp.lt.s32.totalorder %s1383_s27, 63  ;;  %s391_s21 = sld [smem:[#allocation5 + %s390_s13]] }
  0xe9   : > { %s1552_s22 = smov (!%p666_p11, %s365_s22), 63 }
  0xea   : > { %s671_s0 = sshll.u32 %s1552_s22, 4 }
  0xeb   : > { %s369_s25 = scalar_lea.hbm %s1498_s1, %s671_s0 }
  0xec   : > { %s968_s2 = scalar_lea.hbm %s369_s25, 16  ;;  %p971_p13 = scmp.lt.u32.totalorder %s369_s25, %s1498_s1 }
  0xed   : > { %p969_p4 = scmp.ne.s32.totalorder %s369_s25, %s968_s2  ;;  %p972_p0 = scmp.lt.u32.totalorder %s1297_s6, %s968_s2 }
  0xee   : > { %p974_p1 = scmp.lt.u32.totalorder %s968_s2, %s369_s25 }
  0xef   : > { %p973_p9 = por %p972_p0, %p971_p13 }
  0xf1   : > { %p975_p12 = por %p974_p1, %p973_p9 }
  0xf3   : > { %p976_p10 = pnand %p975_p12, %p969_p4 }
  0xf5   : > { %979 = shalt.err (!%p976_p10)  }
  0xf6   : > { %s980_s20 = scalar_lea.vmem %s380_s18, 16  ;;  %p985_p3 = scmp.lt.s32.totalorder %s380_s18, %s1277_s24 }
  0xf7   : > { %p981_p2 = scmp.ne.s32.totalorder %s380_s18, %s980_s20  ;;  %p986_p5 = scmp.lt.s32.totalorder %s1306_s11, %s980_s20 }
  0xf9   : > { %p987_p8 = por %p986_p5, %p985_p3 }
  0xfb   : > { %p988_p6 = pnand %p987_p8, %p981_p2 }
  0xfd   : > { %991 = shalt.err (!%p988_p6)  }
  0xfe   : > { %382 = dma.hbm_to_vmem [thread:$0]  %s369_s25, 16, %s380_s18, [#allocation3 + $0x6] }
  0xff   : > { %p392_p7 = scmp.gt.s32.totalorder %s391_s21, 0  ;;  %p673_p11 = scmp.lt.s32.totalorder %s391_s21, 63 }
 0x100   : > { %s1127_s27 = smov [#allocation2 + $0x7]  }
 0x101   : > { %s407_s13 = sshll.u32 %s1127_s27, 4  ;;  %s1554_s21 = smov (!%p392_p7, %s391_s21), 0  ;;  %s408_s13 = int_to_ptr.vmem [resolvable:$true] %s407_s13 }
 0x102   : > { %s1556_s21 = smov (!%p673_p11, %s1554_s21), 63 }
 0x103   : > { %s678_s16 = sshll.u32 %s1556_s21, 4 }
 0x104   : > { %s397_s22 = scalar_lea.hbm %s1498_s1, %s678_s16 }
 0x105   : > { %s992_s0 = scalar_lea.hbm %s397_s22, 16  ;;  %p995_p13 = scmp.lt.u32.totalorder %s397_s22, %s1498_s1 }
 0x106   : > { %p993_p4 = scmp.ne.s32.totalorder %s397_s22, %s992_s0  ;;  %p996_p0 = scmp.lt.u32.totalorder %s1297_s6, %s992_s0 }
 0x107   : > { %p998_p1 = scmp.lt.u32.totalorder %s992_s0, %s397_s22 }
 0x108   : > { %p997_p9 = por %p996_p0, %p995_p13 }
 0x10a   : > { %p999_p12 = por %p998_p1, %p997_p9 }
 0x10c   : > { %p1000_p10 = pnand %p999_p12, %p993_p4 }
 0x10e   : > { %1003 = shalt.err (!%p1000_p10)  }
 0x10f   : > { %s1004_s18 = scalar_lea.vmem %s408_s13, 16  ;;  %p1009_p3 = scmp.lt.s32.totalorder %s408_s13, %s1277_s24 }
 0x110   : > { %p1005_p2 = scmp.ne.s32.totalorder %s408_s13, %s1004_s18  ;;  %p1010_p5 = scmp.lt.s32.totalorder %s1306_s11, %s1004_s18 }
 0x112   : > { %p1011_p8 = por %p1010_p5, %p1009_p3 }
 0x114   : > { %p1012_p6 = pnand %p1011_p8, %p1005_p2 }
 0x116   : > { %1015 = shalt.err (!%p1012_p6)  }
 0x117   : > { %410 = dma.hbm_to_vmem [thread:$0]  %s397_s22, 16, %s408_s13, [#allocation3 + $0x7] }
 0x118   : > { %s188_s21 = scalar_lea.vmem [#allocation9], %s1273_s19 }
 0x119   : > { %1074 = dma.done.wait [#allocation3], 16 }
 0x11a   : > { %1075 = vsyncadd [#allocation3], 4294967280 }
 0x11b   : > { %1076 = dma.done.wait [#allocation3 + $0x1], 16 }
 0x11c   : > { %1077 = vsyncadd [#allocation3 + $0x1], 4294967280 }
 0x11d   : > { %1078 = dma.done.wait [#allocation3 + $0x2], 16 }
 0x11e   : > { %1079 = vsyncadd [#allocation3 + $0x2], 4294967280 }
 0x11f   : > { %1080 = dma.done.wait [#allocation3 + $0x3], 16 }
 0x120   : > { %1081 = vsyncadd [#allocation3 + $0x3], 4294967280 }
 0x121   : > { %1082 = dma.done.wait [#allocation3 + $0x4], 16 }
 0x122   : > { %1083 = vsyncadd [#allocation3 + $0x4], 4294967280 }
 0x123   : > { %1084 = dma.done.wait [#allocation3 + $0x5], 16 }
 0x124   : > { %1085 = vsyncadd [#allocation3 + $0x5], 4294967280 }
 0x125   : > { %1086 = dma.done.wait [#allocation3 + $0x6], 16 }
 0x126   : > { %1087 = vsyncadd [#allocation3 + $0x6], 4294967280 }
 0x127   : > { %1088 = dma.done.wait [#allocation3 + $0x7], 16 }
 0x128   : > { %1089 = vsyncadd [#allocation3 + $0x7], 4294967280  ;;  %v428_v0 = vld [vmem:[#allocation2] sm:$0xff]  ;;  %v429_v1 = vld [vmem:[#allocation6] sm:$0xff]  ;;  %s475_s2 = sshll.u32 %s188_s21, 4  ;;  %s1446_s20 = scalar_lea.hbm %s1502_s5, %s1269_s23  ;;  %s1448_s2 = int_to_ptr.vmem [resolvable:$true] %s475_s2 }
 0x129   : > { %v430_v2 = vadd.f32 %v429_v1, %v428_v0  ;;  %v679_v11 = vld [vmem:[%s1500_s3] ss:$0 sm:$0xff]  ;;  %s1524_s27 = sand.u32 1, %s1100_s29   ;;  %s1016_s16 = scalar_lea.vmem %s1448_s2, 128 }
 0x12a   : > { %v680_v13 = vld [vmem:[%s1501_s4] ss:$0 sm:$0xff]  ;;  %s461_s13 = scalar_lea.sflag [#allocation8], %s1524_s27  ;;  %p1017_p7 = scmp.ne.s32.totalorder %s1448_s2, %s1016_s16 }
 0x12b   : > { %431 = vadd.xlane.f32.xlu0 %v430_v2  ;;  %p1525_p11 = scmp.ne.s32.totalorder %s1513_s12, 0  ;;  %s1128_s17 = smov [#allocation9]  }
 0x12c   : > { %s1020_s10 = sshll.u32 %s1128_s17, 4  ;;  %s1021_s10 = int_to_ptr.vmem [resolvable:$false] %s1020_s10 }
 0x12d   : > { %p1018_p4 = pnand %p1017_p7, %p1525_p11  ;;  %s1022_s22 = scalar_lea.vmem %s1021_s10, 256 }
 0x12e   : > { %p1023_p0 = scmp.lt.s32.totalorder %s1448_s2, %s1021_s10  ;;  %p1024_p9 = scmp.lt.s32.totalorder %s1022_s22, %s1016_s16 }
 0x12f   : > { %p1019_p13 = pneg %p1018_p4 }
 0x130   : > { %p1025_p1 = por %p1024_p9, %p1023_p0 }
 0x132   : > { %p1026_p12 = pnand %p1025_p1, %p1019_p13 }
 0x1b8   : > { %v432_v3 = vpop.xlane.xlu0 %431 }
 0x1b9   : > { %v434_v4 = vmul.f32 0.0078125, %v432_v3 }
 0x1bb   : > { %v435_v5 = vsub.f32 %v430_v2, %v434_v4 }
 0x1bd   : > { %v436_v6 = vmul.f32 %v435_v5, %v435_v5 }
 0x1bf   : > { %437 = vadd.xlane.f32.xlu0 %v436_v6 }
 0x24c   : > { %v438_v7 = vpop.xlane.xlu0 %437 }
 0x24d   : > { %v439_v8 = vmul.f32 0.0078125, %v438_v7 }
 0x24f   : > { %v440_v9 = vadd.f32 1e-12, %v439_v8 }
 0x251   : > { %784 = vrsqrt.f32 %v440_v9 }
 0x25b   : > { %v785_v10 = vpop.eup %784 }
 0x25c   : > { %v442_v12 = vmul.f32 %v785_v10, %v435_v5 }
 0x25e   : > { %v450_v14 = vmul.f32 %v679_v11, %v442_v12 }
 0x260   : > { %v458_v15 = vadd.f32 %v680_v13, %v450_v14 }
 0x262   : > { %459 = vst [vmem:[%s188_s21] sm:$0xff] %v458_v15 }
 0x263   : > { %1029 = shalt.err (!%p1026_p12)
}
 0x264   : > { %s1030_s23 = scalar_lea.hbm %s1446_s20, 128  ;;  %s1034_s15 = scalar_lea.hbm %s1502_s5, 256 }
 0x265   : > { %p1031_p10 = scmp.ne.s32.totalorder %s1446_s20, %s1030_s23  ;;  %p1035_p5 = scmp.lt.u32.totalorder %s1446_s20, %s1502_s5 }
 0x266   : > { %p1036_p8 = scmp.lt.u32.totalorder %s1034_s15, %s1030_s23  ;;  %p1038_p7 = scmp.lt.u32.totalorder %s1030_s23, %s1446_s20 }
 0x267   : > { %p1032_p2 = pnand %p1031_p10, %p1525_p11 }
 0x268   : > { %p1037_p6 = por %p1036_p8, %p1035_p5 }
 0x269   : > { %p1033_p3 = pneg %p1032_p2 }
 0x26a   : > { %p1039_p4 = por %p1038_p7, %p1037_p6 }
 0x26c   : > { %p1040_p13 = pnand %p1039_p4, %p1033_p3 }
 0x26e   : > { %1043 = shalt.err (!%p1040_p13)
}
 0x26f   : > { %713 = dma.vmem_to_hbm [thread:$0]  (%p1525_p11), %s1448_s2, 128, %s1446_s20, %s461_s13  }
 0x270 PF: > { %p725_p0 = scmp.ge.s32.totalorder %s1116_s8, 2  ;;  %s487_s21 = sand.u32 1, %s1096_s28  }
 0x271   : > { %p1526_p9 = scmp.ne.s32.totalorder %s1514_s14, 0  ;;  %s488_s24 = scalar_lea.sflag [#allocation8], %s487_s21 }
 0x273   : > { %p720_p1 = pnand %p725_p0, %p1526_p9 }
 0x275   : > { %1091 = dma.done.wait (!%p720_p1), %s488_s24, 128  }
 0x276   : > { %1093 = vsyncadd (!%p720_p1), %s488_s24, 4294967168  ;;  %s23_s8 = sadd.s32 1, %s1116_s8   ;;  %s1527_s12 = sld [smem:[#allocation41_spill]] }
 0x277   : > { %p20_p12 = scmp.ge.s32.totalorder %s23_s8, 4   ;;  %s1528_s6 = sld [smem:[#allocation39_spill]] }
 0x278   : > { %s1529_s7 = sld [smem:[#allocation40_spill]]  ;;  %s1530_s28 = smov %s1100_s29 }
 0x279   : > { %s1531_s29 = smov %s1104_s30  ;;  %22 = sbr.rel (!%p20_p12) target bundleno = 17 (0x11), region = 131 }
 0x27c   : > { %s1532_s30 = smov %s1527_s12 }
 0x280   :  { %493 = vsyncpa [#allocation7], 1 }
 0x281   :  { %495 = vsyncpa [#allocation7 + $0x1], 1 }
 0x282   :  { %496 = vsyncpa [#allocation8], 1 }
 0x283   :  { %498 = vsyncpa [#allocation8 + $0x1], 1 }
 0x284   :  { %499 = vsyncmov [#allocation3] }
 0x287   :  { %s500_s14 = vpop.sfrf %499 }
 0x288   :  { %p685_p11 = scmp.ne.s32.totalorder %s500_s14, 0 }
 0x28a   :  { %504 = shalt.err (%p685_p11)  }
 0x28b   :  { %506 = vsyncmov [#allocation3 + $0x1] }
 0x28e   :  { %s507_s11 = vpop.sfrf %506 }
 0x28f   :  { %p686_p10 = scmp.ne.s32.totalorder %s507_s11, 0 }
 0x291   :  { %511 = shalt.err (%p686_p10)  }
 0x292   :  { %513 = vsyncmov [#allocation3 + $0x2] }
 0x295   :  { %s514_s25 = vpop.sfrf %513 }
 0x296   :  { %p687_p2 = scmp.ne.s32.totalorder %s514_s25, 0 }
 0x298   :  { %518 = shalt.err (%p687_p2)  }
 0x299   :  { %520 = vsyncmov [#allocation3 + $0x3] }
 0x29c   :  { %s521_s2 = vpop.sfrf %520 }
 0x29d   :  { %p688_p3 = scmp.ne.s32.totalorder %s521_s2, 0 }
 0x29f   :  { %525 = shalt.err (%p688_p3)  }
 0x2a0   :  { %527 = vsyncmov [#allocation3 + $0x4] }
 0x2a3   :  { %s528_s1 = vpop.sfrf %527 }
 0x2a4   :  { %p689_p5 = scmp.ne.s32.totalorder %s528_s1, 0 }
 0x2a6   :  { %532 = shalt.err (%p689_p5)  }
 0x2a7   :  { %534 = vsyncmov [#allocation3 + $0x5] }
 0x2aa   :  { %s535_s3 = vpop.sfrf %534 }
 0x2ab   :  { %p690_p8 = scmp.ne.s32.totalorder %s535_s3, 0 }
 0x2ad   :  { %539 = shalt.err (%p690_p8)  }
 0x2ae   :  { %541 = vsyncmov [#allocation3 + $0x6] }
 0x2b1   :  { %s542_s4 = vpop.sfrf %541 }
 0x2b2   :  { %p691_p6 = scmp.ne.s32.totalorder %s542_s4, 0 }
 0x2b4   :  { %546 = shalt.err (%p691_p6)  }
 0x2b5   :  { %548 = vsyncmov [#allocation3 + $0x7] }
 0x2b8   :  { %s549_s5 = vpop.sfrf %548 }
 0x2b9   :  { %p692_p7 = scmp.ne.s32.totalorder %s549_s5, 0 }
 0x2bb   :  { %553 = shalt.err (%p692_p7)  }

</bundles_post_ra>
